<compile_context>
chip_gen: v6e
topology: v6e:2x2x1
jax: 0.10.0
libtpu: 0.0.40
codegen_flags: <defaults>
</compile_context>

<pallas_src>
import jax
import jax.numpy as jnp
from jax.experimental import pallas as pl
from jax.experimental.pallas import tpu as pltpu

# ----------------------------------------------------------------------------
# Graph machinery (faithful port of the PyTorch reference, pure Python)
# ----------------------------------------------------------------------------
sep = '/'

has_inputs = lambda node: type(node) is tuple


def normpath(path):
    parts = []
    for p in path.split(sep):
        if p == '..':
            parts.pop()
        elif p.startswith(sep):
            parts = [p]
        else:
            parts.append(p)
    return sep.join(parts)


def path_iter(nested_dict, pfx=()):
    for name, val in nested_dict.items():
        if isinstance(val, dict):
            yield from path_iter(val, (*pfx, name))
        else:
            yield ((*pfx, name), val)


def pipeline(net):
    return [(sep.join(path), node if has_inputs(node) else (node, [-1]))
            for path, node in path_iter(net)]


def build_graph(net):
    flattened = pipeline(net)
    resolve_input = lambda rel_path, path, idx: (
        normpath(sep.join((path, '..', rel_path)))
        if isinstance(rel_path, str) else flattened[idx + rel_path][0])
    return {path: (node[0],
                   [resolve_input(rel_path, path, idx) for rel_path in node[1]])
            for idx, (path, node) in enumerate(flattened)}


class Network:
    """JAX/Pallas port of the PyTorch Network graph executor."""

    def __init__(self, net):
        self.graph = build_graph(net)
        for path, (val, _) in self.graph.items():
            setattr(self, path.replace('/', '_'), val)

    def nodes(self):
        return (node for node, _ in self.graph.values())

    def forward(self, inputs):
        outputs = dict(inputs)
        for k, (node, ins) in self.graph.items():
            if k not in outputs:
                outputs[k] = node(*[outputs[x] for x in ins])
        return outputs

    __call__ = forward

    # TODO(synk): Network.half() (fp16 cast of non-BN modules) is approximated
    # by bf16 matmul inputs with f32 accumulation; no module-wide fp16 cast.


# ----------------------------------------------------------------------------
# Pallas kernels
# ----------------------------------------------------------------------------
_VMEM_LIMIT = 32 * 1024 * 1024  # explicit scoped-VMEM budget (fits v7x 64 MiB)


def _pick_tile(n, target):
    """Largest divisor of n that is <= target and a multiple of 8 (else n)."""
    t = min(n, target)
    while t >= 8:
        if n % t == 0 and t % 8 == 0:
            return t
        t -= 1
    return n


def _conv_stats_kernel(col_ref, w_ref, y_ref, s1_ref, s2_ref):
    # One wide-K matmul per M-tile (K = 9*Cin, bf16 in / f32 acc) fused with
    # the per-channel sum / sum-of-squares needed for BatchNorm batch stats.
    # s1/s2 blocks stay resident across the (arbitrary) M grid axis.
    i = pl.program_id(0)
    y = jnp.dot(col_ref[...], w_ref[...], preferred_element_type=jnp.float32)
    y_ref[...] = y

    @pl.when(i == 0)
    def _init():
        s1_ref[...] = jnp.zeros_like(s1_ref)
        s2_ref[...] = jnp.zeros_like(s2_ref)

    s1_ref[...] += jnp.sum(y, axis=0, keepdims=True)
    s2_ref[...] += jnp.sum(y * y, axis=0, keepdims=True)


def _affine_relu_kernel(x_ref, scale_ref, shift_ref, o_ref):
    # Fused BN scale/shift + ReLU on a lane-dense (rows, W*C) view.
    o_ref[...] = jnp.maximum(x_ref[...] * scale_ref[...] + shift_ref[...], 0.0)


def _maxpool_kernel(x_ref, o_ref):
    # x: (rows, k, Wo, k, C) -- free view of the NHWC activation.
    # Reduce ky with elementwise max across leading-axis slices (VPU), then
    # reduce kx with a sublane reduction.  No window tensor in HBM.
    kh = x_ref.shape[1]
    acc = x_ref[:, 0, :, :, :]                      # (rows, Wo, k, C)
    for ky in range(1, kh):
        acc = jnp.maximum(acc, x_ref[:, ky, :, :, :])
    o_ref[...] = jnp.max(acc, axis=2)               # (rows, Wo, C)


def _linear_kernel(x_ref, w_ref, b_ref, o_ref):
    # bf16 inputs, f32 accumulate, 128-lane padded output (lane-dense store).
    o_ref[...] = jnp.dot(x_ref[...], w_ref[...],
                         preferred_element_type=jnp.float32) + b_ref[...]


# ----------------------------------------------------------------------------
# Node wrappers (parameter setup + cheap reshape-view glue in plain JAX)
# ----------------------------------------------------------------------------
class ConvBnRelu:
    """Fused Conv2d(cin,cout,3,pad=1,bias=False) + BatchNorm2d (training-mode
    batch stats) + ReLU.  NHWC activations."""

    def __init__(self, key, cin, cout, eps=1e-5):
        scale = 1.0 / (3 * 3 * cin) ** 0.5
        w = jax.random.normal(key, (3, 3, cin, cout), jnp.float32) * scale
        self.w = w.reshape(9 * cin, cout).astype(jnp.bfloat16)   # (9*Cin, Cout)
        self.gamma = jnp.ones((cout,), jnp.float32)
        self.beta = jnp.zeros((cout,), jnp.float32)
        self.eps = eps
        # TODO(synk): running_mean/var tracking (eval-mode BN) not implemented.

    def __call__(self, x):
        N, H, W, Cin = x.shape
        Cout = self.w.shape[-1]
        M, K = N * H * W, 9 * Cin

        # im2col rows (M, 9*Cin) in bf16: one wide-K contraction instead of 9
        # shallow K=Cin dots (review option (b)); bf16 halves the HBM traffic.
        xp = jnp.pad(x, ((0, 0), (1, 1), (1, 1), (0, 0)))
        col = jnp.concatenate(
            [xp[:, ky:ky + H, kx:kx + W, :] for ky in range(3) for kx in range(3)],
            axis=-1).reshape(M, K).astype(jnp.bfloat16)

        # Pass A: conv matmul + per-channel sum / sumsq, tiled over M.
        tm = _pick_tile(M, 256)
        y, s1, s2 = pl.pallas_call(
            _conv_stats_kernel,
            grid=(M // tm,),
            in_specs=[pl.BlockSpec((tm, K), lambda i: (i, 0)),
                      pl.BlockSpec((K, Cout), lambda i: (0, 0))],
            out_specs=(pl.BlockSpec((tm, Cout), lambda i: (i, 0)),
                       pl.BlockSpec((1, Cout), lambda i: (0, 0)),
                       pl.BlockSpec((1, Cout), lambda i: (0, 0))),
            out_shape=(jax.ShapeDtypeStruct((M, Cout), jnp.float32),
                       jax.ShapeDtypeStruct((1, Cout), jnp.float32),
                       jax.ShapeDtypeStruct((1, Cout), jnp.float32)),
            compiler_params=pltpu.CompilerParams(
                dimension_semantics=("arbitrary",),   # stats accumulate here
                vmem_limit_bytes=_VMEM_LIMIT),
        )(col, self.w)

        # Finalize BN batch statistics (tiny per-channel vectors, plain XLA).
        mean = s1[0] / M
        var = s2[0] / M - mean * mean
        scale = self.gamma * jax.lax.rsqrt(var + self.eps)
        shift = self.beta - mean * scale

        # Pass B: lane-dense fused scale/shift + ReLU on the free
        # (N*H, W*Cout) view (last dim is a multiple of 128).
        y2 = y.reshape(N * H, W * Cout)                 # contiguous view, free
        srow = jnp.tile(scale, W)[None, :]              # col w*Cout+c -> scale[c]
        brow = jnp.tile(shift, W)[None, :]
        tr = _pick_tile(N * H, 16)
        out = pl.pallas_call(
            _affine_relu_kernel,
            grid=(N * H // tr,),
            in_specs=[pl.BlockSpec((tr, W * Cout), lambda i: (i, 0)),
                      pl.BlockSpec((1, W * Cout), lambda i: (0, 0)),
                      pl.BlockSpec((1, W * Cout), lambda i: (0, 0))],
            out_specs=pl.BlockSpec((tr, W * Cout), lambda i: (i, 0)),
            out_shape=jax.ShapeDtypeStruct((N * H, W * Cout), jnp.float32),
            compiler_params=pltpu.CompilerParams(
                dimension_semantics=("parallel",),
                vmem_limit_bytes=_VMEM_LIMIT),
        )(y2, srow, brow)
        return out.reshape(N, H, W, Cout)


class MaxPool2d:
    def __init__(self, k):
        self.k = k

    def __call__(self, x):
        k = self.k
        N, H, W, C = x.shape
        Ho, Wo = H // k, W // k
        # Free view -- no windowed copy / transpose in HBM.
        xv = x.reshape(N * Ho, k, Wo, k, C)
        out = pl.pallas_call(
            _maxpool_kernel,
            grid=(N,),
            in_specs=[pl.BlockSpec((Ho, k, Wo, k, C),
                                   lambda n: (n, 0, 0, 0, 0))],
            out_specs=pl.BlockSpec((Ho, Wo, C), lambda n: (n, 0, 0)),
            out_shape=jax.ShapeDtypeStruct((N * Ho, Wo, C), jnp.float32),
            compiler_params=pltpu.CompilerParams(
                dimension_semantics=("parallel",),
                vmem_limit_bytes=_VMEM_LIMIT),
        )(xv)
        return out.reshape(N, Ho, Wo, C)


class Flatten:
    def __call__(self, x):
        # TODO(synk): PyTorch flattens CHW; this flattens HWC (fine for random
        # init, wrong for ported checkpoints).
        return x.reshape(x.shape[0], -1)


class Linear:
    def __init__(self, key, fin, fout):
        kw, kb = jax.random.split(key)
        scale = 1.0 / fin ** 0.5
        self.fout = fout
        fpad = ((fout + 127) // 128) * 128           # lane-dense padded output
        w = jax.random.normal(kw, (fin, fout), jnp.float32) * scale
        b = jax.random.normal(kb, (fout,), jnp.float32) * scale
        self.w = jnp.pad(w, ((0, 0), (0, fpad - fout))).astype(jnp.bfloat16)
        self.b = jnp.pad(b, (0, fpad - fout))[None, :]   # (1, fpad) f32

    def __call__(self, x):
        # TODO(synk): add M/K grid tiling for realistic batch sizes; at B=2
        # the whole problem is a single VMEM block.
        B = x.shape[0]
        fpad = self.w.shape[1]
        out = pl.pallas_call(
            _linear_kernel,
            out_shape=jax.ShapeDtypeStruct((B, fpad), jnp.float32),
            in_specs=[pl.BlockSpec(memory_space=pltpu.MemorySpace.VMEM)] * 3,
            out_specs=pl.BlockSpec(memory_space=pltpu.MemorySpace.VMEM),
            compiler_params=pltpu.CompilerParams(vmem_limit_bytes=_VMEM_LIMIT),
        )(x.astype(jnp.bfloat16), self.w, self.b)
        return out[:, :self.fout]


# ----------------------------------------------------------------------------
# Main
# ----------------------------------------------------------------------------
if __name__ == "__main__":
    N, CIN, H, W = 2, 4, 16, 16
    CH, NCLS, POOL = 32, 10, 4

    key = jax.random.PRNGKey(0)
    kx, kconv, klin = jax.random.split(key, 3)

    # Concrete net instantiation (cifar10-fast style nested dict).
    net = {
        'input': (None, []),
        'prep': {
            'conv_bn_relu': ConvBnRelu(kconv, CIN, CH),   # fused node
        },
        'pool': MaxPool2d(POOL),
        'flatten': Flatten(),
        'linear': Linear(klin, (H // POOL) * (W // POOL) * CH, NCLS),
    }

    model = Network(net)

    # PyTorch-style NCHW input, transposed to the kernel's NHWC layout.
    x_nchw = jax.random.normal(kx, (N, CIN, H, W), jnp.float32)
    x = jnp.transpose(x_nchw, (0, 2, 3, 1))   # layout: NCHW -> NHWC

    outputs = model({'input': x})
    logits = outputs['linear']
    jax.block_until_ready(logits)

    assert logits.shape == (N, NCLS), logits.shape
    assert outputs['prep/conv_bn_relu'].shape == (N, H, W, CH)
    assert outputs['pool'].shape == (N, H // POOL, W // POOL, CH)
    assert bool(jnp.all(jnp.isfinite(logits)))

    # Cross-check against a plain-jnp reference (loose tol: bf16 matmuls).
    prep = net['prep']['conv_bn_relu']
    xp = jnp.pad(x, ((0, 0), (1, 1), (1, 1), (0, 0)))
    col = jnp.concatenate(
        [xp[:, ky:ky + H, kx:kx + W, :] for ky in range(3) for kx in range(3)],
        axis=-1).reshape(N * H * W, 9 * CIN)
    y = col @ prep.w.astype(jnp.float32)
    mean, var = y.mean(0), y.var(0)
    ref_prep = jnp.maximum(
        (y - mean) * jax.lax.rsqrt(var + prep.eps) * prep.gamma + prep.beta,
        0.0).reshape(N, H, W, CH)
    ref_pool = ref_prep.reshape(
        N, H // POOL, POOL, W // POOL, POOL, CH).max(axis=(2, 4))
    ref_logits = (ref_pool.reshape(N, -1) @ model.linear.w.astype(jnp.float32)
                  + model.linear.b)[:, :NCLS]
    assert bool(jnp.allclose(outputs['prep/conv_bn_relu'], ref_prep, atol=1e-1))
    assert bool(jnp.allclose(outputs['pool'], ref_pool, atol=1e-1))
    assert bool(jnp.allclose(logits, ref_logits, atol=2e-1))

    print("KERNEL_OK")
</pallas_src>

<mosaic_0001>
module attributes {stable_mosaic.version = 11 : i64} {
  func.func @_conv_stats_kernel(%arg0: i32, %arg1: memref<256x36xbf16, #tpu.memory_space<vmem>>, %arg2: memref<36x32xbf16, #tpu.memory_space<vmem>>, %arg3: memref<256x32xf32, #tpu.memory_space<vmem>>, %arg4: memref<1x32xf32, #tpu.memory_space<vmem>>, %arg5: memref<1x32xf32, #tpu.memory_space<vmem>>) attributes {dimension_semantics = [#tpu.dimension_semantics<arbitrary>], iteration_bounds = array<i64: 2>, scalar_prefetch = 0 : i64, scratch_operands = 0 : i64, tpu.core_type = #tpu.core_type<tc>, window_params = [{transform_indices = @transform_0, window_bounds = array<i64: 256, 36>}, {pipeline_mode = #tpu.pipeline_mode<synchronous>, transform_indices = @transform_1, window_bounds = array<i64: 36, 32>}, {transform_indices = @transform_2, window_bounds = array<i64: 256, 32>}, {pipeline_mode = #tpu.pipeline_mode<synchronous>, transform_indices = @transform_3, window_bounds = array<i64: 1, 32>}, {pipeline_mode = #tpu.pipeline_mode<synchronous>, transform_indices = @transform_4, window_bounds = array<i64: 1, 32>}]} {
    %c0 = arith.constant 0 : index
    %c0_0 = arith.constant 0 : index
    %0 = vector.load %arg1[%c0, %c0_0] : memref<256x36xbf16, #tpu.memory_space<vmem>>, vector<256x36xbf16>
    %c0_1 = arith.constant 0 : index
    %c0_2 = arith.constant 0 : index
    %1 = vector.load %arg2[%c0_1, %c0_2] : memref<36x32xbf16, #tpu.memory_space<vmem>>, vector<36x32xbf16>
    %cst = arith.constant dense<0.000000e+00> : vector<256x32xf32>
    %2 = tpu.matmul %0, %1, %cst {dimension_numbers = #tpu.dot_dimension_numbers<[1], [0], [0], [1], [0, 0, 1, 1], [], []>} : vector<256x36xbf16>, vector<36x32xbf16>, vector<256x32xf32> -> vector<256x32xf32>
    %c0_3 = arith.constant 0 : index
    %c0_4 = arith.constant 0 : index
    %3 = vector.load %arg3[%c0_3, %c0_4] : memref<256x32xf32, #tpu.memory_space<vmem>>, vector<256x32xf32>
    tpu.vector_store %arg3[%c0_3, %c0_4], %2 {strides = array<i32>} : memref<256x32xf32, #tpu.memory_space<vmem>>, vector<256x32xf32>,
    %c0_i32 = arith.constant 0 : i32
    %4 = arith.cmpi eq, %arg0, %c0_i32 : i32
    %5 = arith.extui %4 : i1 to i32
    %c0_i32_5 = arith.constant 0 : i32
    %6 = arith.cmpi ne, %5, %c0_i32_5 : i32
    scf.if %6 {
      %cst_16 = arith.constant 0.000000e+00 : f32
      %18 = vector.broadcast %cst_16 : f32 to vector<1x32xf32>
      %c0_17 = arith.constant 0 : index
      %c0_18 = arith.constant 0 : index
      %19 = vector.load %arg4[%c0_17, %c0_18] : memref<1x32xf32, #tpu.memory_space<vmem>>, vector<1x32xf32>
      tpu.vector_store %arg4[%c0_17, %c0_18], %18 {strides = array<i32>} : memref<1x32xf32, #tpu.memory_space<vmem>>, vector<1x32xf32>,
      %cst_19 = arith.constant 0.000000e+00 : f32
      %20 = vector.broadcast %cst_19 : f32 to vector<1x32xf32>
      %c0_20 = arith.constant 0 : index
      %c0_21 = arith.constant 0 : index
      %21 = vector.load %arg5[%c0_20, %c0_21] : memref<1x32xf32, #tpu.memory_space<vmem>>, vector<1x32xf32>
      tpu.vector_store %arg5[%c0_20, %c0_21], %20 {strides = array<i32>} : memref<1x32xf32, #tpu.memory_space<vmem>>, vector<1x32xf32>,
    } else {
    }
    %c0_6 = arith.constant 0 : index
    %c0_7 = arith.constant 0 : index
    %7 = vector.load %arg4[%c0_6, %c0_7] : memref<1x32xf32, #tpu.memory_space<vmem>>, vector<1x32xf32>
    %cst_8 = arith.constant dense<0.000000e+00> : vector<32xf32>
    %8 = vector.multi_reduction <add>, %2, %cst_8 [0] : vector<256x32xf32> to vector<32xf32>
    %9 = vector.shape_cast %8 : vector<32xf32> to vector<1x32xf32>
    %10 = arith.addf %7, %9 : vector<1x32xf32>
    %c0_9 = arith.constant 0 : index
    %c0_10 = arith.constant 0 : index
    %11 = vector.load %arg4[%c0_9, %c0_10] : memref<1x32xf32, #tpu.memory_space<vmem>>, vector<1x32xf32>
    tpu.vector_store %arg4[%c0_9, %c0_10], %10 {strides = array<i32>} : memref<1x32xf32, #tpu.memory_space<vmem>>, vector<1x32xf32>,
    %c0_11 = arith.constant 0 : index
    %c0_12 = arith.constant 0 : index
    %12 = vector.load %arg5[%c0_11, %c0_12] : memref<1x32xf32, #tpu.memory_space<vmem>>, vector<1x32xf32>
    %13 = arith.mulf %2, %2 : vector<256x32xf32>
    %cst_13 = arith.constant dense<0.000000e+00> : vector<32xf32>
    %14 = vector.multi_reduction <add>, %13, %cst_13 [0] : vector<256x32xf32> to vector<32xf32>
    %15 = vector.shape_cast %14 : vector<32xf32> to vector<1x32xf32>
    %16 = arith.addf %12, %15 : vector<1x32xf32>
    %c0_14 = arith.constant 0 : index
    %c0_15 = arith.constant 0 : index
    %17 = vector.load %arg5[%c0_14, %c0_15] : memref<1x32xf32, #tpu.memory_space<vmem>>, vector<1x32xf32>
    tpu.vector_store %arg5[%c0_14, %c0_15], %16 {strides = array<i32>} : memref<1x32xf32, #tpu.memory_space<vmem>>, vector<1x32xf32>,
    return
  }
  func.func @transform_0(%arg0: i32) -> (i32, i32) {
    %c0_i32 = arith.constant 0 : i32
    %c0_i32_0 = arith.constant 0 : i32
    return %arg0, %c0_i32 : i32, i32
  }
  func.func @transform_1(%arg0: i32) -> (i32, i32) {
    %c0_i32 = arith.constant 0 : i32
    %c0_i32_0 = arith.constant 0 : i32
    %c0_i32_1 = arith.constant 0 : i32
    return %c0_i32, %c0_i32_0 : i32, i32
  }
  func.func @transform_2(%arg0: i32) -> (i32, i32) {
    %c0_i32 = arith.constant 0 : i32
    %c0_i32_0 = arith.constant 0 : i32
    return %arg0, %c0_i32 : i32, i32
  }
  func.func @transform_3(%arg0: i32) -> (i32, i32) {
    %c0_i32 = arith.constant 0 : i32
    %c0_i32_0 = arith.constant 0 : i32
    %c0_i32_1 = arith.constant 0 : i32
    return %c0_i32, %c0_i32_0 : i32, i32
  }
  func.func @transform_4(%arg0: i32) -> (i32, i32) {
    %c0_i32 = arith.constant 0 : i32
    %c0_i32_0 = arith.constant 0 : i32
    %c0_i32_1 = arith.constant 0 : i32
    return %c0_i32, %c0_i32_0 : i32, i32
  }
}

</mosaic_0001>

<bundles_post_ra>
// kernel: tpu_custom_call.1
= control target key start
LH: loop header
LB: loop body
LE: loop exit
PB: predicated region body
PF: predicated region fallthrough
CT: control target
= control target key end

     0   :  { %10 = vsyncpa [#allocation3], 0  ;;  %s1529_s0 = inlined_call_operand.vmem [shape: bf16[512,36], index: 0, kind: input, shape index: {}]   ;;  %s1530_s1 = inlined_call_operand.vmem [shape: bf16[36,32], index: 1, kind: input, shape index: {}]   ;;  %s1531_s2 = inlined_call_operand.vmem [shape: f32[512,32], index: 2, kind: output, shape index: {0}]   ;;  %s1532_s3 = inlined_call_operand.hbm [shape: f32[1,32], index: 3, kind: output, shape index: {1}]   ;;  %s1533_s4 = inlined_call_operand.hbm [shape: f32[1,32], index: 4, kind: output, shape index: {2}]  }
   0x1   :  { %11 = vsyncpa [#allocation5], 0  ;;  %s1114_s15 = smov 0  }
   0x2 LB: > { %s1120_s16 = sadd.s32 4294967295, %s1084_s15   ;;  %p868_p0 = scmp.ge.s32.totalorder %s1084_s15, 1  ;;  %s1084_s15 = sphi %s1114_s15, %s17_s15  }
   0x3   : > { %p160_p1 = scmp.lt.s32.totalorder %s1084_s15, 3 }
   0x5   : > { %p161_p2 = pnand %p868_p0, %p160_p1 }
   0x6   : > { %s869_s21 = sshll.u32 (!%p161_p2), %s1120_s16, 5  ;;  %p908_p4 = scmp.ne.s32.totalorder (!%p161_p2), %s1120_s16, 0 }
   0x7   : > { %164 = sbr.rel (%p161_p2) target bundleno = 353 (0x161), region = 28  ;;  %p187_p3 = scmp.lt.s32.totalorder (!%p161_p2), %s869_s21, 63 }
   0xc   : > { %v1003_v0 = vld [vmem:[%s1530_s1 + $0x10] ss:$0 sps:$4 sm:$0x33]   ;;  %vm380_vm0 = vcmask 1041408   ;;  %v1004_v1 = vld [vmem:[%s1530_s1 + $0x8] sm:$0xff]   ;;  %v1005_v3 = vld [vmem:[%s1530_s1] sm:$0xff]  }
   0xd   : > { %978 = vmatprep.subr.msk.bf16.mxu0 %vm380_vm0, %v1003_v0  ;;  %979 = vmatprep.subr.msk.bf16.mxu1 %vm380_vm0, %v1003_v0  ;;  %v382_v2 = vsel %vm380_vm0, %v1003_v0, 0  ;;  %s1535_s21 = smov (!%p187_p3, %s869_s21), 63  ;;  %vm331_vm1 = vcmask 293888   ;;  %vm545_vm2 = vcmask 261120  }
   0xe   : > { %935 = vmatpush3.bf16.msra.mxu0 %v382_v2  ;;  %975 = vmatpush3.bf16.msra.mxu1 %v382_v2  ;;  %s870_s24 = sshll.u32 %s1535_s21, 2  ;;  %s872_s28 = sshll.u32 %s1535_s21, 3 }
   0xf   : > { %936 = vmatprep.subr.bf16.mxu0 %v1004_v1  ;;  %973 = vmatprep.subr.bf16.mxu1 %v1004_v1  ;;  %s1140_s27 = scalar_lea.vmem %s1529_s0, %s870_s24  ;;  %s1178_s5 = scalar_lea.vmem %s1531_s2, %s872_s28 }
  0x10   : > { %v1006_v4 = vld [vmem:[%s1140_s27] sm:$0xff]   ;;  %v1008_v6 = vld [vmem:[%s1140_s27 + $0x8] sm:$0xff]   ;;  %v1010_v8 = vld [vmem:[%s1140_s27 + $0x10] sm:$0xff]  }
  0x11   : > { %v1007_v5 = vld [vmem:[%s1140_s27 + $0x40] sm:$0xff]   ;;  %940 = vmatprep.mubr.msk.bf16.mxu0 %vm331_vm1, %v1006_v4  ;;  %v1009_v7 = vld [vmem:[%s1140_s27 + $0x48] sm:$0xff]   ;;  %v1011_v9 = vld [vmem:[%s1140_s27 + $0x50] sm:$0xff]  }
  0x12   : > { %937 = vmatpush3.bf16.msra.mxu0 %v1004_v1  ;;  %976 = vmatpush3.bf16.msra.mxu1 %v1004_v1  ;;  %v1012_v10 = vld [vmem:[%s1140_s27 + $0x18] sm:$0xff]   ;;  %v1014_v12 = vld [vmem:[%s1140_s27 + $0x20] sm:$0xff]   ;;  %v1016_v14 = vld [vmem:[%s1140_s27 + $0x28] sm:$0xff]  }
  0x13   : > { %938 = vmatprep.subr.bf16.mxu0 %v1005_v3  ;;  %974 = vmatprep.subr.bf16.mxu1 %v1005_v3  ;;  %v1013_v11 = vld [vmem:[%s1140_s27 + $0x58] sm:$0xff]   ;;  %v1015_v13 = vld [vmem:[%s1140_s27 + $0x60] sm:$0xff]   ;;  %v1017_v15 = vld [vmem:[%s1140_s27 + $0x68] sm:$0xff]  }
  0x14   : > { %956 = vmatprep.mubr.msk.bf16.mxu1 %vm331_vm1, %v1007_v5  ;;  %v1018_v16 = vld [vmem:[%s1140_s27 + $0x30] sm:$0xff]   ;;  %v1020_v18 = vld [vmem:[%s1140_s27 + $0x38] sm:$0xff]  }
  0x15   : > { %v1019_v17 = vld [vmem:[%s1140_s27 + $0x70] sm:$0xff]   ;;  %v1021_v19 = vld [vmem:[%s1140_s27 + $0x78] sm:$0xff]  }
  0x16   : > { %939 = vmatpush3.bf16.msra.mxu0 %v1005_v3  ;;  %977 = vmatpush3.bf16.msra.mxu1 %v1005_v3 }
  0x19   : > { %941 = vmatmul.mubr.msk.bf16.vlgmr.msra.gmra.mxu0 %vm331_vm1, %v1008_v6  ;;  %957 = vmatmul.mubr.msk.bf16.vlgmr.msra.gmra.mxu1 %vm331_vm1, %v1009_v7 }
  0x1a   : > { %944 = vmatprep.mubr.msk.bf16.mxu0 %vm331_vm1, %v1010_v8  ;;  %960 = vmatprep.mubr.msk.bf16.mxu1 %vm331_vm1, %v1011_v9 }
  0x21   : > { %945 = vmatmul.mubr.msk.bf16.gmra.mxu0 %vm331_vm1, %v1012_v10  ;;  %961 = vmatmul.mubr.msk.bf16.gmra.mxu1 %vm331_vm1, %v1013_v11 }
  0x22   : > { %948 = vmatprep.mubr.msk.bf16.mxu0 %vm331_vm1, %v1014_v12  ;;  %964 = vmatprep.mubr.msk.bf16.mxu1 %vm331_vm1, %v1015_v13 }
  0x29   : > { %949 = vmatmul.mubr.msk.bf16.gmra.mxu0 %vm331_vm1, %v1016_v14  ;;  %965 = vmatmul.mubr.msk.bf16.gmra.mxu1 %vm331_vm1, %v1017_v15 }
  0x2a   : > { %952 = vmatprep.mubr.msk.bf16.mxu0 %vm331_vm1, %v1018_v16  ;;  %968 = vmatprep.mubr.msk.bf16.mxu1 %vm331_vm1, %v1019_v17 }
  0x31   : > { %953 = vmatmul.mubr.msk.bf16.gmra.mxu0 %vm331_vm1, %v1020_v18  ;;  %969 = vmatmul.mubr.msk.bf16.gmra.mxu1 %vm331_vm1, %v1021_v19 }
  0xd9   : > { %v1180_v20 = vpop.f32.mrf.mxu0  ;;  %v1182_v21 = vpop.f32.mrf.mxu1 }
  0xda   : > { %548 = vst.msk [vmem:[%s1178_s5 + $0x10] sm:$0xff] %vm545_vm2, %v1180_v20  ;;  %564 = vst.msk [vmem:[%s1178_s5 + $0x90] sm:$0xff] %vm545_vm2, %v1182_v21 }
  0xdb   : > { %v1190_v22 = vpop.f32.mrf.mxu0  ;;  %v1192_v23 = vpop.f32.mrf.mxu1 }
  0xdc   : > { %546 = vst.msk [vmem:[%s1178_s5] sm:$0xff] %vm545_vm2, %v1190_v22  ;;  %562 = vst.msk [vmem:[%s1178_s5 + $0x80] sm:$0xff] %vm545_vm2, %v1192_v23 }
  0xdd   : > { %v1200_v24 = vpop.f32.mrf.mxu0  ;;  %v1202_v25 = vpop.f32.mrf.mxu1 }
  0xde   : > { %549 = vst.msk [vmem:[%s1178_s5 + $0x18] sm:$0xff] %vm545_vm2, %v1200_v24  ;;  %565 = vst.msk [vmem:[%s1178_s5 + $0x98] sm:$0xff] %vm545_vm2, %v1202_v25 }
  0xdf   : > { %v1210_v26 = vpop.f32.mrf.mxu0  ;;  %v1212_v27 = vpop.f32.mrf.mxu1 }
  0xe0   : > { %547 = vst.msk [vmem:[%s1178_s5 + $0x8] sm:$0xff] %vm545_vm2, %v1210_v26  ;;  %563 = vst.msk [vmem:[%s1178_s5 + $0x88] sm:$0xff] %vm545_vm2, %v1212_v27 }
  0xe1   : > { %v1220_v28 = vpop.f32.mrf.mxu0  ;;  %v1222_v29 = vpop.f32.mrf.mxu1 }
  0xe2   : > { %552 = vst.msk [vmem:[%s1178_s5 + $0x30] sm:$0xff] %vm545_vm2, %v1220_v28  ;;  %568 = vst.msk [vmem:[%s1178_s5 + $0xb0] sm:$0xff] %vm545_vm2, %v1222_v29 }
  0xe3   : > { %v1230_v30 = vpop.f32.mrf.mxu0  ;;  %v1232_v31 = vpop.f32.mrf.mxu1 }
  0xe4   : > { %550 = vst.msk [vmem:[%s1178_s5 + $0x20] sm:$0xff] %vm545_vm2, %v1230_v30  ;;  %566 = vst.msk [vmem:[%s1178_s5 + $0xa0] sm:$0xff] %vm545_vm2, %v1232_v31 }
  0xe5   : > { %v1240_v32 = vpop.f32.mrf.mxu0  ;;  %v1242_v33 = vpop.f32.mrf.mxu1 }
  0xe6   : > { %553 = vst.msk [vmem:[%s1178_s5 + $0x38] sm:$0xff] %vm545_vm2, %v1240_v32  ;;  %569 = vst.msk [vmem:[%s1178_s5 + $0xb8] sm:$0xff] %vm545_vm2, %v1242_v33 }
  0xe7   : > { %v1250_v34 = vpop.f32.mrf.mxu0  ;;  %v1252_v35 = vpop.f32.mrf.mxu1 }
  0xe8   : > { %551 = vst.msk [vmem:[%s1178_s5 + $0x28] sm:$0xff] %vm545_vm2, %v1250_v34  ;;  %567 = vst.msk [vmem:[%s1178_s5 + $0xa8] sm:$0xff] %vm545_vm2, %v1252_v35 }
  0xe9   : > { %v1260_v36 = vpop.f32.mrf.mxu0  ;;  %v1262_v37 = vpop.f32.mrf.mxu1 }
  0xea   : > { %556 = vst.msk [vmem:[%s1178_s5 + $0x50] sm:$0xff] %vm545_vm2, %v1260_v36  ;;  %572 = vst.msk [vmem:[%s1178_s5 + $0xd0] sm:$0xff] %vm545_vm2, %v1262_v37 }
  0xeb   : > { %v1270_v38 = vpop.f32.mrf.mxu0  ;;  %v1272_v39 = vpop.f32.mrf.mxu1 }
  0xec   : > { %554 = vst.msk [vmem:[%s1178_s5 + $0x40] sm:$0xff] %vm545_vm2, %v1270_v38  ;;  %570 = vst.msk [vmem:[%s1178_s5 + $0xc0] sm:$0xff] %vm545_vm2, %v1272_v39 }
  0xed   : > { %v1280_v40 = vpop.f32.mrf.mxu0  ;;  %v1282_v41 = vpop.f32.mrf.mxu1 }
  0xee   : > { %557 = vst.msk [vmem:[%s1178_s5 + $0x58] sm:$0xff] %vm545_vm2, %v1280_v40  ;;  %573 = vst.msk [vmem:[%s1178_s5 + $0xd8] sm:$0xff] %vm545_vm2, %v1282_v41 }
  0xef   : > { %v1290_v42 = vpop.f32.mrf.mxu0  ;;  %v1292_v43 = vpop.f32.mrf.mxu1 }
  0xf0   : > { %555 = vst.msk [vmem:[%s1178_s5 + $0x48] sm:$0xff] %vm545_vm2, %v1290_v42  ;;  %571 = vst.msk [vmem:[%s1178_s5 + $0xc8] sm:$0xff] %vm545_vm2, %v1292_v43 }
  0xf1   : > { %v1300_v44 = vpop.f32.mrf.mxu0  ;;  %v1302_v45 = vpop.f32.mrf.mxu1 }
  0xf2   : > { %560 = vst.msk [vmem:[%s1178_s5 + $0x70] sm:$0xff] %vm545_vm2, %v1300_v44  ;;  %576 = vst.msk [vmem:[%s1178_s5 + $0xf0] sm:$0xff] %vm545_vm2, %v1302_v45 }
  0xf3   : > { %v1310_v46 = vpop.f32.mrf.mxu0  ;;  %v1312_v47 = vpop.f32.mrf.mxu1 }
  0xf4   : > { %558 = vst.msk [vmem:[%s1178_s5 + $0x60] sm:$0xff] %vm545_vm2, %v1310_v46  ;;  %574 = vst.msk [vmem:[%s1178_s5 + $0xe0] sm:$0xff] %vm545_vm2, %v1312_v47  ;;  %581 = sbr.rel (%p908_p4) target bundleno = 251 (0xfb), region = 32 }
  0xf5   : > { %v1320_v48 = vpop.f32.mrf.mxu0  ;;  %v1322_v49 = vpop.f32.mrf.mxu1 }
  0xf6   : > { %561 = vst.msk [vmem:[%s1178_s5 + $0x78] sm:$0xff] %vm545_vm2, %v1320_v48  ;;  %577 = vst.msk [vmem:[%s1178_s5 + $0xf8] sm:$0xff] %vm545_vm2, %v1322_v49 }
  0xf7   : > { %v1330_v50 = vpop.f32.mrf.mxu0  ;;  %v1332_v51 = vpop.f32.mrf.mxu1 }
  0xf8   : > { %559 = vst.msk [vmem:[%s1178_s5 + $0x68] sm:$0xff] %vm545_vm2, %v1330_v50  ;;  %575 = vst.msk [vmem:[%s1178_s5 + $0xe8] sm:$0xff] %vm545_vm2, %v1332_v51 }
  0xf9   : > { %vm582_vm3 = vcmask 253952   ;;  %v1086_v52 = vmov 0.0  }
  0xfa   : > { %583 = vst.msk [vmem:[#allocation2] sm:$0x1] %vm582_vm3, %v1086_v52  ;;  %584 = vst.msk [vmem:[#allocation4] sm:$0x1] %vm582_vm3, %v1086_v52 }
  0xfb PF: > { %v586_v53 = vsel %vm545_vm2, %v1190_v22, 0.0  ;;  %v587_v54 = vsel %vm545_vm2, %v1210_v26, 0.0  ;;  %v589_v55 = vsel %vm545_vm2, %v1180_v20, 0.0  ;;  %v591_v57 = vsel %vm545_vm2, %v1200_v24, 0.0  ;;  %s1087_s6 = smov [#allocation2]   ;;  %p988_p5 = scmp.eq.s32.totalorder %s1120_s16, 1 }
  0xfc   : > { %v588_v56 = vadd.f32 %v587_v54, %v586_v53  ;;  %v593_v59 = vsel %vm545_vm2, %v1230_v30, 0.0  ;;  %v595_v61 = vsel %vm545_vm2, %v1250_v34, 0.0  ;;  %v597_v63 = vsel %vm545_vm2, %v1220_v28, 0.0  ;;  %s778_s7 = sshll.u32 %s1087_s6, 4  ;;  %s779_s7 = int_to_ptr.vmem [resolvable:$true] %s778_s7 }
  0xfd   : > { %v599_v1 = vsel %vm545_vm2, %v1240_v32, 0.0  ;;  %v601_v3 = vsel %vm545_vm2, %v1270_v38, 0.0  ;;  %v603_v5 = vsel %vm545_vm2, %v1290_v42, 0.0  ;;  %v659_v6 = vmul.f32 %v1190_v22, %v1190_v22  ;;  %s1022_s8 = scalar_lea.vmem %s779_s7, 16  ;;  %s1028_s9 = scalar_lea.vmem %s779_s7, 32 }
  0xfe   : > { %v590_v58 = vadd.f32 %v589_v55, %v588_v56  ;;  %v660_v7 = vmul.f32 %v1210_v26, %v1210_v26  ;;  %v661_v9 = vmul.f32 %v1180_v20, %v1180_v20  ;;  %v605_v10 = vsel %vm545_vm2, %v1260_v36, 0.0  ;;  %p1023_p6 = scmp.ne.s32.totalorder %s779_s7, %s1022_s8  ;;  %p1029_p9 = scmp.lt.s32.totalorder %s779_s7, %s779_s7 }
  0xff   : > { %v662_v11 = vmul.f32 %v1200_v24, %v1200_v24  ;;  %v607_v13 = vsel %vm545_vm2, %v1280_v40, 0.0  ;;  %v663_v14 = vmul.f32 %v1230_v30, %v1230_v30  ;;  %v691_v15 = vsel %vm545_vm2, %v659_v6, 0.0  ;;  %p1030_p10 = scmp.lt.s32.totalorder %s1028_s9, %s1022_s8 }
 0x100   : > { %v592_v60 = vadd.f32 %v591_v57, %v590_v58  ;;  %v692_v16 = vsel %vm545_vm2, %v660_v7, 0.0  ;;  %v694_v19 = vsel %vm545_vm2, %v661_v9, 0.0  ;;  %v609_v20 = vsel %vm545_vm2, %v1310_v46, 0.0  ;;  %p1024_p7 = pnand %p1023_p6, %p988_p5 }
 0x101   : > { %v693_v18 = vadd.f32 %v692_v16, %v691_v15  ;;  %v664_v22 = vmul.f32 %v1250_v34, %v1250_v34  ;;  %v696_v24 = vsel %vm545_vm2, %v662_v11, 0.0  ;;  %v611_v30 = vsel %vm545_vm2, %v1330_v50, 0.0  ;;  %p1031_p11 = por %p1030_p10, %p1029_p9 }
 0x102   : > { %v594_v62 = vadd.f32 %v593_v59, %v592_v60  ;;  %v665_v53 = vmul.f32 %v1220_v28, %v1220_v28  ;;  %v698_v54 = vsel %vm545_vm2, %v663_v14, 0.0  ;;  %v613_v57 = vsel %vm545_vm2, %v1300_v44, 0.0  ;;  %p1025_p8 = pneg %p1024_p7 }
 0x103   : > { %v695_v52 = vadd.f32 %v694_v19, %v693_v18  ;;  %v666_v34 = vmul.f32 %v1240_v32, %v1240_v32  ;;  %v700_v58 = vsel %vm545_vm2, %v664_v22, 0.0  ;;  %v667_v28 = vmul.f32 %v1270_v38, %v1270_v38 }
 0x104   : > { %v596_v0 = vadd.f32 %v595_v61, %v594_v62  ;;  %v615_v61 = vsel %vm545_vm2, %v1320_v48, 0.0  ;;  %v702_v62 = vsel %vm545_vm2, %v665_v53, 0.0  ;;  %v668_v32 = vmul.f32 %v1290_v42, %v1290_v42  ;;  %p1032_p12 = pnand %p1031_p11, %p1025_p8 }
 0x105   : > { %v697_v56 = vadd.f32 %v696_v24, %v695_v52  ;;  %v669_v38 = vmul.f32 %v1260_v36, %v1260_v36  ;;  %v706_v6 = vsel %vm545_vm2, %v667_v28, 0.0  ;;  %v621_v9 = vsel %vm545_vm2, %v1182_v21, 0.0 }
 0x106   : > { %v598_v2 = vadd.f32 %v597_v63, %v596_v0  ;;  %v670_v42 = vmul.f32 %v1280_v40, %v1280_v40  ;;  %v671_v36 = vmul.f32 %v1310_v46, %v1310_v46  ;;  %v672_v40 = vmul.f32 %v1330_v50, %v1330_v50 }
 0x107   : > { %v699_v60 = vadd.f32 %v698_v54, %v697_v56  ;;  %v710_v14 = vsel %vm545_vm2, %v669_v38, 0.0  ;;  %v627_v22 = vsel %vm545_vm2, %v1252_v35, 0.0  ;;  %v673_v46 = vmul.f32 %v1300_v44, %v1300_v44 }
 0x108   : > { %v600_v4 = vadd.f32 %v599_v1, %v598_v2  ;;  %v617_v1 = vsel %vm545_vm2, %v1192_v23, 0.0  ;;  %v704_v2 = vsel %vm545_vm2, %v666_v34, 0.0  ;;  %v712_v18 = vsel %vm545_vm2, %v670_v42, 0.0 }
 0x109   : > { %v701_v0 = vadd.f32 %v700_v58, %v699_v60  ;;  %v714_v24 = vsel %vm545_vm2, %v671_v36, 0.0  ;;  %v674_v50 = vmul.f32 %v1320_v48, %v1320_v48  ;;  %v716_v53 = vsel %vm545_vm2, %v672_v40, 0.0 }
 0x10a   : > { %v602_v8 = vadd.f32 %v601_v3, %v600_v4  ;;  %v631_v56 = vsel %vm545_vm2, %v1242_v33, 0.0  ;;  %v675_v44 = vmul.f32 %v1192_v23, %v1192_v23  ;;  %v676_v48 = vmul.f32 %v1212_v27, %v1212_v27 }
 0x10b   : > { %v703_v4 = vadd.f32 %v702_v62, %v701_v0  ;;  %v720_v60 = vsel %vm545_vm2, %v674_v50, 0.0  ;;  %v635_v62 = vsel %vm545_vm2, %v1292_v43, 0.0  ;;  %v677_v23 = vmul.f32 %v1182_v21, %v1182_v21 }
 0x10c   : > { %v604_v12 = vadd.f32 %v603_v5, %v602_v8  ;;  %v619_v5 = vsel %vm545_vm2, %v1212_v27, 0.0  ;;  %v678_v27 = vmul.f32 %v1202_v25, %v1202_v25  ;;  %v679_v21 = vmul.f32 %v1232_v31, %v1232_v31 }
 0x10d   : > { %v705_v8 = vadd.f32 %v704_v2, %v703_v4  ;;  %v724_v2 = vsel %vm545_vm2, %v676_v48, 0.0  ;;  %v726_v38 = vsel %vm545_vm2, %v677_v23, 0.0  ;;  %v647_v40 = vsel %vm545_vm2, %v1322_v49, 0.0 }
 0x10e   : > { %v606_v17 = vadd.f32 %v605_v10, %v604_v12  ;;  %v708_v10 = vsel %vm545_vm2, %v668_v32, 0.0  ;;  %v637_v32 = vsel %vm545_vm2, %v1262_v37, 0.0  ;;  %vm656_vm4 = vcmask 253952  }
 0x10f   : > { %v707_v12 = vadd.f32 %v706_v6, %v705_v8  ;;  %v641_v8 = vsel %vm545_vm2, %v1312_v47, 0.0 }
 0x110   : > { %v608_v26 = vadd.f32 %v607_v13, %v606_v17  ;;  %v623_v13 = vsel %vm545_vm2, %v1202_v25, 0.0  ;;  %v625_v17 = vsel %vm545_vm2, %v1232_v31, 0.0  ;;  %v680_v25 = vmul.f32 %v1252_v35, %v1252_v35 }
 0x111   : > { %v709_v16 = vadd.f32 %v708_v10, %v707_v12  ;;  %v681_v31 = vmul.f32 %v1222_v29, %v1222_v29  ;;  %v730_v12 = vsel %vm545_vm2, %v679_v21, 0.0  ;;  %v682_v35 = vmul.f32 %v1242_v33, %v1242_v33 }
 0x112   : > { %v610_v55 = vadd.f32 %v609_v20, %v608_v26 }
 0x113   : > { %v711_v20 = vadd.f32 %v710_v14, %v709_v16  ;;  %v645_v14 = vsel %vm545_vm2, %v1302_v45, 0.0 }
 0x114   : > { %v612_v59 = vadd.f32 %v611_v30, %v610_v55  ;;  %v629_v30 = vsel %vm545_vm2, %v1222_v29, 0.0  ;;  %v683_v29 = vmul.f32 %v1272_v39, %v1272_v39 }
 0x115   : > { %v713_v52 = vadd.f32 %v712_v18, %v711_v20  ;;  %v734_v18 = vsel %vm545_vm2, %v681_v31, 0.0 }
 0x116   : > { %v614_v63 = vadd.f32 %v613_v57, %v612_v59  ;;  %v718_v57 = vsel %vm545_vm2, %v673_v46, 0.0  ;;  %v633_v59 = vsel %vm545_vm2, %v1272_v39, 0.0  ;;  %v736_v46 = vsel %vm545_vm2, %v682_v35, 0.0 }
 0x117   : > { %v715_v55 = vadd.f32 %v714_v24, %v713_v52  ;;  %v738_v52 = vsel %vm545_vm2, %v683_v29, 0.0  ;;  %v686_v39 = vmul.f32 %v1282_v41, %v1282_v41 }
 0x118   : > { %v616_v3 = vadd.f32 %v615_v61, %v614_v63  ;;  %v722_v63 = vsel %vm545_vm2, %v675_v44, 0.0 }
 0x119   : > { %v717_v58 = vadd.f32 %v716_v53, %v715_v55 }
 0x11a   : > { %v618_v7 = vadd.f32 %v617_v1, %v616_v3 }
 0x11b   : > { %v719_v28 = vadd.f32 %v718_v57, %v717_v58 }
 0x11c   : > { %v620_v11 = vadd.f32 %v619_v5, %v618_v7  ;;  %v639_v5 = vsel %vm545_vm2, %v1282_v41, 0.0  ;;  %v689_v41 = vmul.f32 %v1302_v45, %v1302_v45 }
 0x11d   : > { %v721_v1 = vadd.f32 %v720_v60, %v719_v28  ;;  %v690_v28 = vmul.f32 %v1322_v49, %v1322_v49 }
 0x11e   : > { %v622_v15 = vadd.f32 %v621_v9, %v620_v11  ;;  %v728_v9 = vsel %vm545_vm2, %v678_v27, 0.0  ;;  %v643_v11 = vsel %vm545_vm2, %v1332_v51, 0.0 }
 0x11f   : > { %v723_v4 = vadd.f32 %v722_v63, %v721_v1  ;;  %v750_v63 = vsel %vm545_vm2, %v689_v41, 0.0  ;;  %v752_v1 = vsel %vm545_vm2, %v690_v28, 0.0 }
 0x120   : > { %v624_v19 = vadd.f32 %v623_v13, %v622_v15  ;;  %v732_v15 = vsel %vm545_vm2, %v680_v25, 0.0 }
 0x121   : > { %v725_v7 = vadd.f32 %v724_v2, %v723_v4 }
 0x122   : > { %v626_v26 = vadd.f32 %v625_v17, %v624_v19 }
 0x123   : > { %v727_v10 = vadd.f32 %v726_v38, %v725_v7 }
 0x124   : > { %v628_v54 = vadd.f32 %v627_v22, %v626_v26  ;;  %v684_v22 = vmul.f32 %v1292_v43, %v1292_v43  ;;  %v685_v26 = vmul.f32 %v1262_v37, %v1262_v37  ;;  %v687_v43 = vmul.f32 %v1312_v47, %v1312_v47  ;;  %v585_v47 = vld [vmem:[#allocation2] sm:$0x1] }
 0x125   : > { %v729_v36 = vadd.f32 %v728_v9, %v727_v10  ;;  %v688_v37 = vmul.f32 %v1332_v51, %v1332_v51 }
 0x126   : > { %v630_v34 = vadd.f32 %v629_v30, %v628_v54  ;;  %v740_v53 = vsel %vm545_vm2, %v684_v22, 0.0  ;;  %v746_v48 = vsel %vm545_vm2, %v687_v43, 0.0 }
 0x127   : > { %v731_v17 = vadd.f32 %v730_v12, %v729_v36 }
 0x128   : > { %v632_v61 = vadd.f32 %v631_v56, %v630_v34  ;;  %v742_v56 = vsel %vm545_vm2, %v685_v26, 0.0  ;;  %v744_v34 = vsel %vm545_vm2, %v686_v39, 0.0 }
 0x129   : > { %v733_v20 = vadd.f32 %v732_v15, %v731_v17 }
 0x12a   : > { %v634_v0 = vadd.f32 %v633_v59, %v632_v61 }
 0x12b   : > { %v735_v24 = vadd.f32 %v734_v18, %v733_v20 }
 0x12c   : > { %v636_v3 = vadd.f32 %v635_v62, %v634_v0  ;;  %v748_v62 = vsel %vm545_vm2, %v688_v37, 0.0 }
 0x12d   : > { %v737_v50 = vadd.f32 %v736_v46, %v735_v24 }
 0x12e   : > { %v638_v6 = vadd.f32 %v637_v32, %v636_v3 }
 0x12f   : > { %v739_v55 = vadd.f32 %v738_v52, %v737_v50 }
 0x130   : > { %v640_v42 = vadd.f32 %v639_v5, %v638_v6 }
 0x131   : > { %v741_v57 = vadd.f32 %v740_v53, %v739_v55 }
 0x132   : > { %v642_v13 = vadd.f32 %v641_v8, %v640_v42 }
 0x133   : > { %v743_v59 = vadd.f32 %v742_v56, %v741_v57 }
 0x134   : > { %v644_v16 = vadd.f32 %v643_v11, %v642_v13 }
 0x135   : > { %v745_v61 = vadd.f32 %v744_v34, %v743_v59 }
 0x136   : > { %v646_v19 = vadd.f32 %v645_v14, %v644_v16 }
 0x137   : > { %v747_v23 = vadd.f32 %v746_v48, %v745_v61 }
 0x138   : > { %v648_v33 = vadd.f32 %v647_v40, %v646_v19 }
 0x139   : > { %v749_v0 = vadd.f32 %v748_v62, %v747_v23 }
 0x13a   : > { %v649_v30 = vrot.slane %v648_v33, 4 }
 0x13b   : > { %v751_v32 = vadd.f32 %v750_v63, %v749_v0 }
 0x13c   : > { %v650_v54 = vadd.f32 %v649_v30, %v648_v33 }
 0x13e   : > { %v651_v44 = vrot.slane %v650_v54, 2 }
 0x140   : > { %v652_v58 = vadd.f32 %v651_v44, %v650_v54 }
 0x142   : > { %v653_v60 = vrot.slane %v652_v58, 1 }
 0x144   : > { %v654_v51 = vadd.f32 %v653_v60, %v652_v58 }
 0x146   : > { %v655_v45 = vadd.f32 %v654_v51, %v585_v47 }
 0x148   : > { %657 = vst.msk [vmem:[#allocation2] sm:$0x1] %vm656_vm4, %v655_v45 }
 0x149   : > { %1035 = shalt.err (!%p1032_p12)
}
 0x14a   : > { %981 = dma.vmem_to_hbm [thread:$0]  (%p988_p5), %s779_s7, 16, %s1532_s3, [#allocation3]   ;;  %v753_v49 = vadd.f32 %v752_v1, %v751_v32  ;;  %v658_v21 = vld [vmem:[#allocation4] sm:$0x1] }
 0x14b   : > { %s1088_s12 = smov [#allocation4]  }
 0x14c   : > { %v754_v27 = vrot.slane %v753_v49, 4  ;;  %s789_s13 = sshll.u32 %s1088_s12, 4  ;;  %s790_s13 = int_to_ptr.vmem [resolvable:$true] %s789_s13 }
 0x14d   : > { %s1046_s14 = scalar_lea.vmem %s790_s13, 16  ;;  %s1052_s17 = scalar_lea.vmem %s790_s13, 32 }
 0x14e   : > { %v755_v2 = vadd.f32 %v754_v27, %v753_v49  ;;  %p1047_p13 = scmp.ne.s32.totalorder %s790_s13, %s1046_s14  ;;  %p1053_p2 = scmp.lt.s32.totalorder %s790_s13, %s790_s13 }
 0x14f   : > { %p1054_p3 = scmp.lt.s32.totalorder %s1052_s17, %s1046_s14 }
 0x150   : > { %v756_v3 = vrot.slane %v755_v2, 2  ;;  %p1048_p0 = pnand %p1047_p13, %p988_p5 }
 0x151   : > { %p1055_p4 = por %p1054_p3, %p1053_p2 }
 0x152   : > { %v757_v4 = vadd.f32 %v756_v3, %v755_v2  ;;  %p1049_p1 = pneg %p1048_p0 }
 0x154   : > { %v758_v5 = vrot.slane %v757_v4, 1  ;;  %p1056_p6 = pnand %p1055_p4, %p1049_p1 }
 0x156   : > { %v759_v38 = vadd.f32 %v758_v5, %v757_v4 }
 0x158   : > { %v760_v6 = vadd.f32 %v759_v38, %v658_v21 }
 0x15a   : > { %761 = vst.msk [vmem:[#allocation4] sm:$0x1] %vm656_vm4, %v760_v6 }
 0x15b   : > { %1059 = shalt.err (!%p1056_p6)
}
 0x15c   : > { %983 = dma.vmem_to_hbm [thread:$0]  (%p988_p5), %s790_s13, 16, %s1533_s4, [#allocation5]  }
 0x15d   : > { %1075 = dma.done.wait (%p988_p5), [#allocation3], 16  }
 0x15e   : > { %1077 = vsyncadd (%p988_p5), [#allocation3], 4294967280 }
 0x15f   : > { %1079 = dma.done.wait (%p988_p5), [#allocation5], 16  }
 0x160   : > { %1081 = vsyncadd (%p988_p5), [#allocation5], 4294967280 }
 0x161 PF: > { %s17_s15 = sadd.s32 1, %s1084_s15  }
 0x162   : > { %p14_p7 = scmp.ge.s32.totalorder %s17_s15, 4  }
 0x164   :  { %16 = sbr.rel (!%p14_p7) target bundleno = 2 (0x2), region = 79 }
 0x169   :  { %814 = vsyncpa [#allocation3], 1 }
 0x16a   :  { %816 = vsyncpa [#allocation3 + $0x1], 1 }
 0x16b   :  { %817 = vsyncpa [#allocation5], 1 }

</bundles_post_ra>
